<compile_context>
chip_gen: v7x
topology: tpu7x:2x2x1
jax: 0.10.0
libtpu: 0.0.40
codegen_flags: <defaults>
</compile_context>

<pallas_src>
import jax
import jax.numpy as jnp
from jax.experimental import pallas as pl
from jax.experimental.pallas import tpu as pltpu


_TARGET_BLOCK_BYTES = 2 * 1024 * 1024  # ~2 MiB / block (x4 with dbl-buffered in+out)


def _pswish_kernel(beta_ref, x_ref, o_ref):
    # beta_ref: scalar-prefetched (1,) f32 array in SMEM.
    beta = beta_ref[0]
    x = x_ref[...]
    xf = x.astype(jnp.float32)
    y = xf * jax.nn.sigmoid(xf * beta)
    o_ref[...] = y.astype(o_ref.dtype)


def pswish(x: jnp.ndarray, beta: jnp.ndarray) -> jnp.ndarray:
    """x: any shape (e.g. NCHW); beta: shape (1,) trainable f32 scalar."""
    orig_shape = x.shape
    orig_dtype = x.dtype
    n = x.size
    flat = x.reshape(-1)

    # Pick a wide, lane-dense width (multiple of 128) that divides n so we
    # avoid pad / slice copies (each is a full extra HBM pass).
    lanes = None
    for cand in (4096, 2048, 1024, 512, 256, 128):
        if n % cand == 0:
            lanes = cand
            break
    padded = False
    if lanes is None:
        # Rare fallback for odd element counts: pad to a multiple of 128 lanes.
        lanes = 128
        n_pad = pl.cdiv(n, lanes) * lanes
        flat = jnp.pad(flat, (0, n_pad - n))
        padded = True

    x2d = flat.reshape(-1, lanes)
    rows = x2d.shape[0]

    # Dtype-aware sublane packing: f32 -> 8, bf16 -> 16, int8/fp8 -> 32.
    itemsize = jnp.dtype(orig_dtype).itemsize
    sub = max(8, 32 // itemsize)

    # Row tile sized to ~2 MiB per block, rounded down to the sublane tile.
    row_tile = max(sub, (_TARGET_BLOCK_BYTES // (lanes * itemsize)) // sub * sub)

    if rows <= row_tile:
        # Whole array in one block (full-extent block shape is always legal).
        block_rows = rows
        grid = (1,)
    else:
        block_rows = row_tile
        grid = (pl.cdiv(rows, row_tile),)  # tail block is masked by Pallas

    out2d = pl.pallas_call(
        _pswish_kernel,
        out_shape=jax.ShapeDtypeStruct((rows, lanes), orig_dtype),
        grid_spec=pltpu.PrefetchScalarGridSpec(
            num_scalar_prefetch=1,  # beta lands in SMEM as f32
            grid=grid,
            in_specs=[
                pl.BlockSpec((block_rows, lanes), lambda i, beta_ref: (i, 0)),
            ],
            out_specs=pl.BlockSpec((block_rows, lanes), lambda i, beta_ref: (i, 0)),
        ),
        compiler_params=pltpu.CompilerParams(
            # Parallel axis lets the v7x megacore split rows across its 2 TCs.
            dimension_semantics=("parallel",),
        ),
    )(beta.astype(jnp.float32), x2d)

    if padded:
        out = out2d.reshape(-1)[:n]
    else:
        out = out2d
    return out.reshape(orig_shape)


if __name__ == "__main__":
    key = jax.random.PRNGKey(0)
    x = jax.random.normal(key, (2, 4, 16, 16), dtype=jnp.float32)  # NCHW

    # Deterministic parameter init matching nn.Parameter(torch.ones([1])).
    beta = jnp.ones((1,), dtype=jnp.float32)

    y = pswish(x, beta)
    y = jax.block_until_ready(y)

    # Reference check in plain JAX.
    y_ref = x * jax.nn.sigmoid(x * beta[0])
    assert y.shape == x.shape and y.dtype == x.dtype
    assert jnp.allclose(y, y_ref, atol=1e-6, rtol=1e-6)

    print("KERNEL_OK")
</pallas_src>

<mosaic_0001>
module attributes {stable_mosaic.version = 11 : i64} {
  func.func @_pswish_kernel(%arg0: i32, %arg1: memref<1xf32, #tpu.memory_space<smem>>, %arg2: memref<1x2048xf32, #tpu.memory_space<vmem>>, %arg3: memref<1x2048xf32, #tpu.memory_space<vmem>>) attributes {dimension_semantics = [#tpu.dimension_semantics<parallel>], iteration_bounds = array<i64: 1>, scalar_prefetch = 1 : i64, scratch_operands = 0 : i64, tpu.core_type = #tpu.core_type<tc>, window_params = [{transform_indices = @transform_0, window_bounds = array<i64: 1, 2048>}, {transform_indices = @transform_1, window_bounds = array<i64: 1, 2048>}]} {
    %c0 = arith.constant 0 : index
    %0 = memref.load %arg1[%c0] : memref<1xf32, #tpu.memory_space<smem>>
    %c0_0 = arith.constant 0 : index
    %c0_1 = arith.constant 0 : index
    %1 = vector.load %arg2[%c0_0, %c0_1] : memref<1x2048xf32, #tpu.memory_space<vmem>>, vector<1x2048xf32>
    %2 = vector.broadcast %0 : f32 to vector<1x2048xf32>
    %3 = arith.mulf %1, %2 : vector<1x2048xf32>
    %4 = arith.negf %3 : vector<1x2048xf32>
    %5 = math.exp %4 : vector<1x2048xf32>
    %cst = arith.constant 1.000000e+00 : f32
    %6 = vector.broadcast %cst : f32 to vector<1x2048xf32>
    %7 = arith.addf %6, %5 : vector<1x2048xf32>
    %8 = arith.divf %6, %7 : vector<1x2048xf32>
    %9 = arith.mulf %1, %8 : vector<1x2048xf32>
    %c0_2 = arith.constant 0 : index
    %c0_3 = arith.constant 0 : index
    %10 = vector.load %arg3[%c0_2, %c0_3] : memref<1x2048xf32, #tpu.memory_space<vmem>>, vector<1x2048xf32>
    tpu.vector_store %arg3[%c0_2, %c0_3], %9 {strides = array<i32>} : memref<1x2048xf32, #tpu.memory_space<vmem>>, vector<1x2048xf32>,
    return
  }
  func.func @transform_0(%arg0: i32, %arg1: memref<1xf32, #tpu.memory_space<smem>>) -> (i32, i32) {
    %c0_i32 = arith.constant 0 : i32
    %c0_i32_0 = arith.constant 0 : i32
    return %arg0, %c0_i32 : i32, i32
  }
  func.func @transform_1(%arg0: i32, %arg1: memref<1xf32, #tpu.memory_space<smem>>) -> (i32, i32) {
    %c0_i32 = arith.constant 0 : i32
    %c0_i32_0 = arith.constant 0 : i32
    return %arg0, %c0_i32 : i32, i32
  }
}

</mosaic_0001>

<bundles_post_ra>
// kernel: tpu_custom_call.1
= control target key start
LH: loop header
LB: loop body
LE: loop exit
PB: predicated region body
PF: predicated region fallthrough
CT: control target
= control target key end

     0   :  { %8 = vsyncpa [#allocation5], 0  ;;  %s164_s0 = inlined_call_operand.<no memory space> [shape: f32[1], index: 0, kind: input, shape index: {}]   ;;  %s165_s1 = inlined_call_operand.hbm [shape: f32[1,2048], index: 1, kind: input, shape index: {}]   ;;  %s166_s2 = inlined_call_operand.hbm [shape: f32[1,2048], index: 2, kind: output, shape index: {}]  }
   0x1   :  { %9 = vsyncpa [#allocation6], 0  ;;  %s120_s9 = smov [#allocation4]   ;;  %s72_s13 = scalar_lea.hbm %s165_s1, 256 }
   0x2   :  { %s16_s10 = sshll.u32 %s120_s9, 4  ;;  %p73_p0 = scmp.ne.s32.totalorder %s165_s1, %s72_s13  ;;  %s17_s10 = int_to_ptr.vmem [resolvable:$true] %s16_s10 }
   0x3   :  { %p76_p1 = scmp.lt.u32.totalorder %s72_s13, %s165_s1 }
   0x5   :  { %p78_p2 = pnand %p76_p1, %p73_p0 }
   0x7   :  { %81 = shalt.err (!%p78_p2)
}
   0x8   :  { %s82_s18 = scalar_lea.vmem %s17_s10, 256  ;;  %p87_p4 = scmp.lt.s32.totalorder %s17_s10, %s17_s10 }
   0x9   :  { %p83_p3 = scmp.ne.s32.totalorder %s17_s10, %s82_s18  ;;  %p88_p5 = scmp.lt.s32.totalorder %s82_s18, %s82_s18 }
   0xb   :  { %p89_p6 = por %p88_p5, %p87_p4 }
   0xd   :  { %p90_p7 = pnand %p89_p6, %p83_p3 }
   0xf   :  { %93 = shalt.err (!%p90_p7)
}
  0x10   :  { %19 = dma.hbm_to_vmem [thread:$0]  %s165_s1, 256, %s17_s10, [#allocation5]  }
  0x11   :  { %116 = dma.done.wait [#allocation5], 256  }
  0x12   :  { %117 = vsyncadd [#allocation5], 4294967040  ;;  %v26_v0 = vstv %s164_s0  ;;  %v24_v1 = vld [vmem:[#allocation4] sm:$0xff]  ;;  %v25_v2 = vld [vmem:[#allocation4 + $0x8] sm:$0xff]  ;;  %s121_s1 = smov [#allocation7]  }
  0x13   :  { %v27_v3 = vmul.f32 %v26_v0, %v24_v1  ;;  %v28_v4 = vmul.f32 %v26_v0, %v25_v2  ;;  %s51_s23 = sshll.u32 %s121_s1, 4  ;;  %s52_s23 = int_to_ptr.vmem [resolvable:$true] %s51_s23 }
  0x14   :  { %s94_s0 = scalar_lea.vmem %s52_s23, 256  ;;  %p99_p9 = scmp.lt.s32.totalorder %s52_s23, %s52_s23 }
  0x15   :  { %v60_v5 = vmul.f32 -1.442695, %v27_v3  ;;  %v61_v6 = vmul.f32 -1.442695, %v28_v4  ;;  %p95_p8 = scmp.ne.s32.totalorder %s52_s23, %s94_s0  ;;  %p100_p10 = scmp.lt.s32.totalorder %s94_s0, %s94_s0 }
  0x17   :  { %64 = vpow2.f32 %v60_v5  ;;  %p101_p11 = por %p100_p10, %p99_p9 }
  0x18   :  { %66 = vpow2.f32 %v61_v6 }
  0x19   :  { %p102_p12 = pnand %p101_p11, %p95_p8 }
  0x21   :  { %v65_v7 = vpop.eup %64 }
  0x22   :  { %v67_v8 = vpop.eup %66  ;;  %v35_v9 = vadd.f32 1.0, %v65_v7 }
  0x23   :  { %v36_v10 = vadd.f32 1.0, %v67_v8 }
  0x24   :  { %68 = vrcp.f32 %v35_v9 }
  0x25   :  { %70 = vrcp.f32 %v36_v10 }
  0x2e   :  { %v69_v11 = vpop.eup %68 }
  0x2f   :  { %v71_v12 = vpop.eup %70  ;;  %v41_v13 = vmul.f32 %v69_v11, %v24_v1 }
  0x30   :  { %v42_v14 = vmul.f32 %v71_v12, %v25_v2 }
  0x31   :  { %43 = vst [vmem:[#allocation7] sm:$0xff] %v41_v13 }
  0x32   :  { %44 = vst [vmem:[#allocation7 + $0x8] sm:$0xff] %v42_v14 }
  0x33   :  { %105 = shalt.err (!%p102_p12)
}
  0x34   :  { %s106_s26 = scalar_lea.hbm %s166_s2, 256 }
  0x35   :  { %p107_p13 = scmp.ne.s32.totalorder %s166_s2, %s106_s26  ;;  %p110_p0 = scmp.lt.u32.totalorder %s106_s26, %s166_s2 }
  0x37   :  { %p112_p1 = pnand %p110_p0, %p107_p13 }
  0x39   :  { %115 = shalt.err (!%p112_p1)
}
  0x3a   :  { %54 = dma.vmem_to_hbm [thread:$0]  %s52_s23, 256, %s166_s2, [#allocation6]  }
  0x3b   :  { %118 = dma.done.wait [#allocation6], 256  }
  0x3c   :  { %119 = vsyncadd [#allocation6], 4294967040 }
  0x3d   :  { %58 = vsyncpa [#allocation5], 1 }
  0x3e   :  { %59 = vsyncpa [#allocation6], 1 }

</bundles_post_ra>
